<compile_context>
chip_gen: v6e
topology: v6e:2x2x1
jax: 0.10.0
libtpu: 0.0.40
codegen_flags: <defaults>
</compile_context>

<pallas_src>
import functools

import jax
import jax.numpy as jnp
from jax import lax
from jax.experimental import pallas as pl
from jax.experimental.pallas import tpu as pltpu

P = 2
MARGIN = 0.2
PDIST_EPS = 1e-12   # pdist clamp (squared=True for p==2)
TML_EPS = 1e-6      # torch.nn.functional.pairwise_distance eps
_INT_MAX = jnp.iinfo(jnp.int32).max


def _default_tile():
    """MXU-aligned tile preference: 128 on v5e (4x128^2 MXU), 256 elsewhere."""
    try:
        kind = jax.devices()[0].device_kind.lower()
    except Exception:
        return 128
    if "v5 lite" in kind or "v5e" in kind or "v5lite" in kind:
        return 128
    return 256


def _pick_tile(n, pref):
    # Keep blocks (8,128)-friendly: either an aligned tile dividing n, or n.
    return pref if (n % pref == 0) else n


# ---------------------------------------------------------------------------
# Kernel 1: fused squared-pdist + batch-hard mining (streaming, no N x N HBM)
# ---------------------------------------------------------------------------
def mine_kernel(e_row_ref, e_col_ref, sq_row_ref, sq_col_ref,
                lab_row_ref, lab_col_ref,
                pos_idx_ref, neg_idx_ref,
                best_pos_d, best_neg_d, best_pos_i, best_neg_i):
    i = pl.program_id(0)          # anchor-row tile
    j = pl.program_id(1)          # candidate-column tile (reduction axis)

    @pl.when(j == 0)
    def _():
        best_pos_d[...] = jnp.full_like(best_pos_d, -jnp.inf)
        best_neg_d[...] = jnp.full_like(best_neg_d, jnp.inf)
        best_pos_i[...] = jnp.zeros_like(best_pos_i)
        best_neg_i[...] = jnp.zeros_like(best_neg_i)

    e_row = e_row_ref[...]                                     # (tm, D)
    e_col = e_col_ref[...]                                     # (tn, D)
    # MXU matmul, contracting feature axis of BOTH operands (no transpose).
    prod = lax.dot_general(e_row, e_col, (((1,), (1,)), ((), ())),
                           preferred_element_type=jnp.float32)  # (tm, tn)
    d = sq_row_ref[...] + sq_col_ref[...] - 2.0 * prod
    d = jnp.maximum(d, PDIST_EPS)

    tm, tn = d.shape
    row_g = i * tm + lax.broadcasted_iota(jnp.int32, (tm, tn), 0)
    col_g = j * tn + lax.broadcasted_iota(jnp.int32, (tm, tn), 1)
    is_self = row_g == col_g
    d = jnp.where(is_self, 0.0, d)                              # pdist diagonal

    same = lab_row_ref[...] == lab_col_ref[...]                 # (tm, tn)
    pos_cand = jnp.where(same & (~is_self), d, -jnp.inf)
    neg_cand = jnp.where(~same, d, jnp.inf)

    tile_pos = jnp.max(pos_cand, axis=1, keepdims=True)         # (tm, 1)
    tile_neg = jnp.min(neg_cand, axis=1, keepdims=True)
    # first-occurrence arg{max,min} within the tile (matches jnp.argmax/argmin)
    tile_pos_i = jnp.min(jnp.where(pos_cand == tile_pos, col_g, _INT_MAX),
                         axis=1, keepdims=True)
    tile_neg_i = jnp.min(jnp.where(neg_cand == tile_neg, col_g, _INT_MAX),
                         axis=1, keepdims=True)

    p_better = tile_pos > best_pos_d[...]                       # strict: keeps
    n_better = tile_neg < best_neg_d[...]                       # first index
    best_pos_i[...] = jnp.where(p_better, tile_pos_i, best_pos_i[...])
    best_neg_i[...] = jnp.where(n_better, tile_neg_i, best_neg_i[...])
    best_pos_d[...] = jnp.maximum(tile_pos, best_pos_d[...])
    best_neg_d[...] = jnp.minimum(tile_neg, best_neg_d[...])

    @pl.when(j == pl.num_programs(1) - 1)
    def _():
        pos_idx_ref[...] = best_pos_i[...]
        neg_idx_ref[...] = best_neg_i[...]


def batch_hard_mine(embeddings, labels):
    n, d_feat = embeddings.shape
    pref = _default_tile()
    tm = _pick_tile(n, pref)
    tn = _pick_tile(n, pref)

    e32 = embeddings.astype(jnp.float32)
    sq = jnp.sum(e32 * e32, axis=1)                              # once, not per tile
    sq_row = sq.reshape(n, 1)
    sq_col = sq.reshape(1, n)
    lab = labels.astype(jnp.int32)
    lab_row = lab.reshape(n, 1)
    lab_col = lab.reshape(1, n)

    itemsize = jnp.dtype(embeddings.dtype).itemsize
    pos_idx, neg_idx = pl.pallas_call(
        mine_kernel,
        out_shape=(jax.ShapeDtypeStruct((n, 1), jnp.int32),
                   jax.ShapeDtypeStruct((n, 1), jnp.int32)),
        grid_spec=pltpu.PrefetchScalarGridSpec(
            num_scalar_prefetch=0,
            grid=(n // tm, n // tn),
            in_specs=[
                pl.BlockSpec((tm, d_feat), lambda i, j: (i, 0)),   # anchor rows
                pl.BlockSpec((tn, d_feat), lambda i, j: (j, 0)),   # candidate rows
                pl.BlockSpec((tm, 1), lambda i, j: (i, 0)),        # row norms
                pl.BlockSpec((1, tn), lambda i, j: (0, j)),        # col norms
                pl.BlockSpec((tm, 1), lambda i, j: (i, 0)),        # row labels
                pl.BlockSpec((1, tn), lambda i, j: (0, j)),        # col labels
            ],
            out_specs=[
                pl.BlockSpec((tm, 1), lambda i, j: (i, 0)),
                pl.BlockSpec((tm, 1), lambda i, j: (i, 0)),
            ],
            scratch_shapes=[
                pltpu.VMEM((tm, 1), jnp.float32),   # best positive distance
                pltpu.VMEM((tm, 1), jnp.float32),   # best negative distance
                pltpu.VMEM((tm, 1), jnp.int32),     # best positive index
                pltpu.VMEM((tm, 1), jnp.int32),     # best negative index
            ],
        ),
        compiler_params=pltpu.CompilerParams(
            dimension_semantics=("parallel", "arbitrary"),
            vmem_limit_bytes=32 * 1024 * 1024,
        ),
        cost_estimate=pl.CostEstimate(
            flops=2 * n * n * d_feat + 4 * n * n,
            transcendentals=0,
            bytes_accessed=(n // tm + n // tn) * n * d_feat * itemsize
                           + 4 * n * 4 + 2 * n * 4,
        ),
    )(embeddings, embeddings, sq_row, sq_col, lab_row, lab_col)
    return pos_idx.reshape(n), neg_idx.reshape(n)


# ---------------------------------------------------------------------------
# Kernel 2: triplet margin loss (p=2) + mean, with fused pos/neg row gathers
# ---------------------------------------------------------------------------
def triplet_loss_kernel(pos_idx_ref, neg_idx_ref,       # scalar-prefetch (SMEM)
                        a_ref, p_ref, n_ref,            # (1,1,D) row blocks
                        out_ref, acc_ref, *, margin, count):
    step = pl.program_id(0)

    @pl.when(step == 0)
    def _():
        acc_ref[...] = jnp.zeros_like(acc_ref)

    a = a_ref[0].astype(jnp.float32)                    # (1, D)
    p = p_ref[0].astype(jnp.float32)
    n = n_ref[0].astype(jnp.float32)
    # F.pairwise_distance: ||x1 - x2 + eps||_p
    d_ap = jnp.sqrt(jnp.sum((a - p + TML_EPS) ** 2, axis=1, keepdims=True))
    d_an = jnp.sqrt(jnp.sum((a - n + TML_EPS) ** 2, axis=1, keepdims=True))
    acc_ref[...] += jnp.maximum(d_ap - d_an + margin, 0.0)

    @pl.when(step == pl.num_programs(0) - 1)
    def _():
        out_ref[...] = acc_ref[...] * (1.0 / count)      # mean (size_average)


def triplet_margin_loss_mean(embeddings, pos_idx, neg_idx, margin):
    n, d_feat = embeddings.shape
    e3 = embeddings.reshape(n, 1, d_feat)                # metadata-only reshape
    out = pl.pallas_call(
        functools.partial(triplet_loss_kernel, margin=margin, count=n),
        out_shape=jax.ShapeDtypeStruct((1, 1), jnp.float32),
        grid_spec=pltpu.PrefetchScalarGridSpec(
            num_scalar_prefetch=2,                       # pos_idx, neg_idx -> SMEM
            grid=(n,),
            in_specs=[
                pl.BlockSpec((1, 1, d_feat), lambda i, pos, neg: (i, 0, 0)),
                pl.BlockSpec((1, 1, d_feat), lambda i, pos, neg: (pos[i], 0, 0)),
                pl.BlockSpec((1, 1, d_feat), lambda i, pos, neg: (neg[i], 0, 0)),
            ],
            out_specs=pl.BlockSpec((1, 1), lambda i, pos, neg: (0, 0)),
            scratch_shapes=[pltpu.VMEM((1, 1), jnp.float32)],
        ),
        compiler_params=pltpu.CompilerParams(
            dimension_semantics=("arbitrary",),
            vmem_limit_bytes=32 * 1024 * 1024,
        ),
    )(pos_idx, neg_idx, e3, e3, e3)
    return out[0, 0]


# ---------------------------------------------------------------------------
# _Triplet.forward equivalent (p=2, reduce=True, size_average=True defaults)
# ---------------------------------------------------------------------------
@jax.jit
def triplet_forward(embeddings, labels, margin=MARGIN):
    pos_idx, neg_idx = batch_hard_mine(embeddings, labels)
    # anchor_idx == arange(N): identity gather removed (anchors = embeddings).
    return triplet_margin_loss_mean(embeddings, pos_idx, neg_idx, margin)


# ---------------------------------------------------------------------------
# Pure-JAX reference (semantics check)
# ---------------------------------------------------------------------------
def _reference(embeddings, labels, margin=MARGIN):
    e = embeddings.astype(jnp.float32)
    n = e.shape[0]
    sq = jnp.sum(e * e, axis=1)
    dd = jnp.maximum(sq[:, None] + sq[None, :] - 2.0 * e @ e.T, PDIST_EPS)
    dd = jnp.where(jnp.eye(n, dtype=bool), 0.0, dd)
    same = labels[:, None] == labels[None, :]
    eye = jnp.eye(n, dtype=bool)
    pos = jnp.argmax(jnp.where(same & ~eye, dd, -jnp.inf), axis=1)
    neg = jnp.argmin(jnp.where(~same, dd, jnp.inf), axis=1)
    p, ng = e[pos], e[neg]
    d_ap = jnp.sqrt(jnp.sum((e - p + TML_EPS) ** 2, axis=1))
    d_an = jnp.sqrt(jnp.sum((e - ng + TML_EPS) ** 2, axis=1))
    return jnp.mean(jnp.maximum(d_ap - d_an + margin, 0.0))


if __name__ == "__main__":
    key = jax.random.PRNGKey(0)
    N, D = 16, 32
    embeddings = jax.random.normal(key, (N, D), dtype=jnp.float32)
    labels = jnp.array([0, 0, 0, 0, 1, 1, 1, 1,
                        2, 2, 2, 2, 3, 3, 3, 3], dtype=jnp.int32)

    loss = triplet_forward(embeddings, labels)
    jax.block_until_ready(loss)

    ref = _reference(embeddings, labels)
    assert loss.shape == () and bool(jnp.isfinite(loss))
    assert abs(float(loss) - float(ref)) < 1e-3, (float(loss), float(ref))
    print("KERNEL_OK")
</pallas_src>

<mosaic_0001>
module attributes {stable_mosaic.version = 11 : i64} {
  func.func @mine_kernel(%arg0: i32, %arg1: i32, %arg2: memref<16x32xf32, #tpu.memory_space<vmem>>, %arg3: memref<16x32xf32, #tpu.memory_space<vmem>>, %arg4: memref<16x1xf32, #tpu.memory_space<vmem>>, %arg5: memref<1x16xf32, #tpu.memory_space<vmem>>, %arg6: memref<16x1xi32, #tpu.memory_space<vmem>>, %arg7: memref<1x16xi32, #tpu.memory_space<vmem>>, %arg8: memref<16x1xi32, #tpu.memory_space<vmem>>, %arg9: memref<16x1xi32, #tpu.memory_space<vmem>>, %arg10: memref<16x1xf32, #tpu.memory_space<vmem>>, %arg11: memref<16x1xf32, #tpu.memory_space<vmem>>, %arg12: memref<16x1xi32, #tpu.memory_space<vmem>>, %arg13: memref<16x1xi32, #tpu.memory_space<vmem>>) attributes {dimension_semantics = [#tpu.dimension_semantics<parallel>, #tpu.dimension_semantics<arbitrary>], iteration_bounds = array<i64: 1, 1>, scalar_prefetch = 0 : i64, scratch_operands = 4 : i64, tpu.core_type = #tpu.core_type<tc>, window_params = [{transform_indices = @transform_0, window_bounds = array<i64: 16, 32>}, {transform_indices = @transform_1, window_bounds = array<i64: 16, 32>}, {transform_indices = @transform_2, window_bounds = array<i64: 16, 1>}, {transform_indices = @transform_3, window_bounds = array<i64: 1, 16>}, {transform_indices = @transform_4, window_bounds = array<i64: 16, 1>}, {transform_indices = @transform_5, window_bounds = array<i64: 1, 16>}, {transform_indices = @transform_6, window_bounds = array<i64: 16, 1>}, {transform_indices = @transform_7, window_bounds = array<i64: 16, 1>}]} {
    %c0_i32 = arith.constant 0 : i32
    %0 = arith.cmpi eq, %arg1, %c0_i32 : i32
    %1 = arith.extui %0 : i1 to i32
    %c0_i32_0 = arith.constant 0 : i32
    %2 = arith.cmpi ne, %1, %c0_i32_0 : i32
    scf.if %2 {
      %cst_47 = arith.constant 0xFF800000 : f32
      %74 = vector.broadcast %cst_47 : f32 to vector<16x1xf32>
      %c0_48 = arith.constant 0 : index
      %c0_49 = arith.constant 0 : index
      %75 = vector.load %arg10[%c0_48, %c0_49] : memref<16x1xf32, #tpu.memory_space<vmem>>, vector<16x1xf32>
      tpu.vector_store %arg10[%c0_48, %c0_49], %74 {strides = array<i32>} : memref<16x1xf32, #tpu.memory_space<vmem>>, vector<16x1xf32>,
      %cst_50 = arith.constant 0x7F800000 : f32
      %76 = vector.broadcast %cst_50 : f32 to vector<16x1xf32>
      %c0_51 = arith.constant 0 : index
      %c0_52 = arith.constant 0 : index
      %77 = vector.load %arg11[%c0_51, %c0_52] : memref<16x1xf32, #tpu.memory_space<vmem>>, vector<16x1xf32>
      tpu.vector_store %arg11[%c0_51, %c0_52], %76 {strides = array<i32>} : memref<16x1xf32, #tpu.memory_space<vmem>>, vector<16x1xf32>,
      %c0_i32_53 = arith.constant 0 : i32
      %78 = vector.broadcast %c0_i32_53 : i32 to vector<16x1xi32>
      %c0_54 = arith.constant 0 : index
      %c0_55 = arith.constant 0 : index
      %79 = vector.load %arg12[%c0_54, %c0_55] : memref<16x1xi32, #tpu.memory_space<vmem>>, vector<16x1xi32>
      tpu.vector_store %arg12[%c0_54, %c0_55], %78 {strides = array<i32>} : memref<16x1xi32, #tpu.memory_space<vmem>>, vector<16x1xi32>,
      %c0_i32_56 = arith.constant 0 : i32
      %80 = vector.broadcast %c0_i32_56 : i32 to vector<16x1xi32>
      %c0_57 = arith.constant 0 : index
      %c0_58 = arith.constant 0 : index
      %81 = vector.load %arg13[%c0_57, %c0_58] : memref<16x1xi32, #tpu.memory_space<vmem>>, vector<16x1xi32>
      tpu.vector_store %arg13[%c0_57, %c0_58], %80 {strides = array<i32>} : memref<16x1xi32, #tpu.memory_space<vmem>>, vector<16x1xi32>,
    } else {
    }
    %c0 = arith.constant 0 : index
    %c0_1 = arith.constant 0 : index
    %3 = vector.load %arg2[%c0, %c0_1] : memref<16x32xf32, #tpu.memory_space<vmem>>, vector<16x32xf32>
    %c0_2 = arith.constant 0 : index
    %c0_3 = arith.constant 0 : index
    %4 = vector.load %arg3[%c0_2, %c0_3] : memref<16x32xf32, #tpu.memory_space<vmem>>, vector<16x32xf32>
    %cst = arith.constant dense<0.000000e+00> : vector<16x16xf32>
    %5 = tpu.matmul %3, %4, %cst {dimension_numbers = #tpu.dot_dimension_numbers<[1], [1], [0], [0], [0, 0, 1, 0], [], []>} : vector<16x32xf32>, vector<16x32xf32>, vector<16x16xf32> -> vector<16x16xf32>
    %c0_4 = arith.constant 0 : index
    %c0_5 = arith.constant 0 : index
    %6 = vector.load %arg4[%c0_4, %c0_5] : memref<16x1xf32, #tpu.memory_space<vmem>>, vector<16x1xf32>
    %c0_6 = arith.constant 0 : index
    %c0_7 = arith.constant 0 : index
    %7 = vector.load %arg5[%c0_6, %c0_7] : memref<1x16xf32, #tpu.memory_space<vmem>>, vector<1x16xf32>
    %8 = vector.broadcast %6 : vector<16x1xf32> to vector<16x16xf32>
    %9 = vector.broadcast %7 : vector<1x16xf32> to vector<16x16xf32>
    %10 = arith.addf %8, %9 : vector<16x16xf32>
    %cst_8 = arith.constant 2.000000e+00 : f32
    %11 = vector.broadcast %cst_8 : f32 to vector<16x16xf32>
    %12 = arith.mulf %11, %5 : vector<16x16xf32>
    %13 = arith.subf %10, %12 : vector<16x16xf32>
    %cst_9 = arith.constant 9.99999996E-13 : f32
    %14 = vector.broadcast %cst_9 : f32 to vector<16x16xf32>
    %15 = arith.maximumf %13, %14 : vector<16x16xf32>
    %c16_i32 = arith.constant 16 : i32
    %16 = arith.muli %arg0, %c16_i32 : i32
    %17 = tpu.iota {dimensions = array<i32: 0>} : vector<16x16xi32>
    %18 = vector.broadcast %16 : i32 to vector<16x16xi32>
    %19 = arith.addi %18, %17 : vector<16x16xi32>
    %c16_i32_10 = arith.constant 16 : i32
    %20 = arith.muli %arg1, %c16_i32_10 : i32
    %21 = tpu.iota {dimensions = array<i32: 1>} : vector<16x16xi32>
    %22 = vector.broadcast %20 : i32 to vector<16x16xi32>
    %23 = arith.addi %22, %21 : vector<16x16xi32>
    %24 = arith.cmpi eq, %19, %23 : vector<16x16xi32>
    %cst_11 = arith.constant 0.000000e+00 : f32
    %25 = vector.broadcast %cst_11 : f32 to vector<16x16xf32>
    %26 = arith.select %24, %25, %15 : vector<16x16xi1>, vector<16x16xf32>
    %c0_12 = arith.constant 0 : index
    %c0_13 = arith.constant 0 : index
    %27 = vector.load %arg6[%c0_12, %c0_13] : memref<16x1xi32, #tpu.memory_space<vmem>>, vector<16x1xi32>
    %c0_14 = arith.constant 0 : index
    %c0_15 = arith.constant 0 : index
    %28 = vector.load %arg7[%c0_14, %c0_15] : memref<1x16xi32, #tpu.memory_space<vmem>>, vector<1x16xi32>
    %29 = vector.broadcast %27 : vector<16x1xi32> to vector<16x16xi32>
    %30 = vector.broadcast %28 : vector<1x16xi32> to vector<16x16xi32>
    %31 = arith.cmpi eq, %29, %30 : vector<16x16xi32>
    %cst_16 = arith.constant dense<true> : vector<16x16xi1>
    %32 = arith.xori %24, %cst_16 : vector<16x16xi1>
    %33 = arith.andi %31, %32 : vector<16x16xi1>
    %cst_17 = arith.constant 0xFF800000 : f32
    %34 = vector.broadcast %cst_17 : f32 to vector<16x16xf32>
    %35 = arith.select %33, %26, %34 : vector<16x16xi1>, vector<16x16xf32>
    %cst_18 = arith.constant dense<true> : vector<16x16xi1>
    %36 = arith.xori %31, %cst_18 : vector<16x16xi1>
    %cst_19 = arith.constant 0x7F800000 : f32
    %37 = vector.broadcast %cst_19 : f32 to vector<16x16xf32>
    %38 = arith.select %36, %26, %37 : vector<16x16xi1>, vector<16x16xf32>
    %cst_20 = arith.constant dense<0xFF800000> : vector<16xf32>
    %39 = vector.multi_reduction <maximumf>, %35, %cst_20 [1] : vector<16x16xf32> to vector<16xf32>
    %40 = vector.shape_cast %39 : vector<16xf32> to vector<16x1xf32>
    %cst_21 = arith.constant dense<0x7F800000> : vector<16xf32>
    %41 = vector.multi_reduction <minimumf>, %38, %cst_21 [1] : vector<16x16xf32> to vector<16xf32>
    %42 = vector.shape_cast %41 : vector<16xf32> to vector<16x1xf32>
    %43 = vector.broadcast %40 : vector<16x1xf32> to vector<16x16xf32>
    %44 = arith.cmpf oeq, %35, %43 : vector<16x16xf32>
    %c2147483647_i32 = arith.constant 2147483647 : i32
    %45 = vector.broadcast %c2147483647_i32 : i32 to vector<16x16xi32>
    %46 = arith.select %44, %23, %45 : vector<16x16xi1>, vector<16x16xi32>
    %cst_22 = arith.constant dense<2147483647> : vector<16xi32>
    %47 = vector.multi_reduction <minsi>, %46, %cst_22 [1] : vector<16x16xi32> to vector<16xi32>
    %48 = vector.shape_cast %47 : vector<16xi32> to vector<16x1xi32>
    %49 = vector.broadcast %42 : vector<16x1xf32> to vector<16x16xf32>
    %50 = arith.cmpf oeq, %38, %49 : vector<16x16xf32>
    %c2147483647_i32_23 = arith.constant 2147483647 : i32
    %51 = vector.broadcast %c2147483647_i32_23 : i32 to vector<16x16xi32>
    %52 = arith.select %50, %23, %51 : vector<16x16xi1>, vector<16x16xi32>
    %cst_24 = arith.constant dense<2147483647> : vector<16xi32>
    %53 = vector.multi_reduction <minsi>, %52, %cst_24 [1] : vector<16x16xi32> to vector<16xi32>
    %54 = vector.shape_cast %53 : vector<16xi32> to vector<16x1xi32>
    %c0_25 = arith.constant 0 : index
    %c0_26 = arith.constant 0 : index
    %55 = vector.load %arg10[%c0_25, %c0_26] : memref<16x1xf32, #tpu.memory_space<vmem>>, vector<16x1xf32>
    %56 = arith.cmpf ogt, %40, %55 : vector<16x1xf32>
    %c0_27 = arith.constant 0 : index
    %c0_28 = arith.constant 0 : index
    %57 = vector.load %arg11[%c0_27, %c0_28] : memref<16x1xf32, #tpu.memory_space<vmem>>, vector<16x1xf32>
    %58 = arith.cmpf olt, %42, %57 : vector<16x1xf32>
    %c0_29 = arith.constant 0 : index
    %c0_30 = arith.constant 0 : index
    %59 = vector.load %arg12[%c0_29, %c0_30] : memref<16x1xi32, #tpu.memory_space<vmem>>, vector<16x1xi32>
    %60 = arith.select %56, %48, %59 : vector<16x1xi1>, vector<16x1xi32>
    %c0_31 = arith.constant 0 : index
    %c0_32 = arith.constant 0 : index
    %61 = vector.load %arg12[%c0_31, %c0_32] : memref<16x1xi32, #tpu.memory_space<vmem>>, vector<16x1xi32>
    tpu.vector_store %arg12[%c0_31, %c0_32], %60 {strides = array<i32>} : memref<16x1xi32, #tpu.memory_space<vmem>>, vector<16x1xi32>,
    %c0_33 = arith.constant 0 : index
    %c0_34 = arith.constant 0 : index
    %62 = vector.load %arg13[%c0_33, %c0_34] : memref<16x1xi32, #tpu.memory_space<vmem>>, vector<16x1xi32>
    %63 = arith.select %58, %54, %62 : vector<16x1xi1>, vector<16x1xi32>
    %c0_35 = arith.constant 0 : index
    %c0_36 = arith.constant 0 : index
    %64 = vector.load %arg13[%c0_35, %c0_36] : memref<16x1xi32, #tpu.memory_space<vmem>>, vector<16x1xi32>
    tpu.vector_store %arg13[%c0_35, %c0_36], %63 {strides = array<i32>} : memref<16x1xi32, #tpu.memory_space<vmem>>, vector<16x1xi32>,
    %c0_37 = arith.constant 0 : index
    %c0_38 = arith.constant 0 : index
    %65 = vector.load %arg10[%c0_37, %c0_38] : memref<16x1xf32, #tpu.memory_space<vmem>>, vector<16x1xf32>
    %66 = arith.maximumf %40, %65 : vector<16x1xf32>
    %c0_39 = arith.constant 0 : index
    %c0_40 = arith.constant 0 : index
    %67 = vector.load %arg10[%c0_39, %c0_40] : memref<16x1xf32, #tpu.memory_space<vmem>>, vector<16x1xf32>
    tpu.vector_store %arg10[%c0_39, %c0_40], %66 {strides = array<i32>} : memref<16x1xf32, #tpu.memory_space<vmem>>, vector<16x1xf32>,
    %c0_41 = arith.constant 0 : index
    %c0_42 = arith.constant 0 : index
    %68 = vector.load %arg11[%c0_41, %c0_42] : memref<16x1xf32, #tpu.memory_space<vmem>>, vector<16x1xf32>
    %69 = arith.minimumf %42, %68 : vector<16x1xf32>
    %c0_43 = arith.constant 0 : index
    %c0_44 = arith.constant 0 : index
    %70 = vector.load %arg11[%c0_43, %c0_44] : memref<16x1xf32, #tpu.memory_space<vmem>>, vector<16x1xf32>
    tpu.vector_store %arg11[%c0_43, %c0_44], %69 {strides = array<i32>} : memref<16x1xf32, #tpu.memory_space<vmem>>, vector<16x1xf32>,
    %c0_i32_45 = arith.constant 0 : i32
    %71 = arith.cmpi eq, %arg1, %c0_i32_45 : i32
    %72 = arith.extui %71 : i1 to i32
    %c0_i32_46 = arith.constant 0 : i32
    %73 = arith.cmpi ne, %72, %c0_i32_46 : i32
    scf.if %73 {
      %c0_47 = arith.constant 0 : index
      %c0_48 = arith.constant 0 : index
      %74 = vector.load %arg12[%c0_47, %c0_48] : memref<16x1xi32, #tpu.memory_space<vmem>>, vector<16x1xi32>
      %c0_49 = arith.constant 0 : index
      %c0_50 = arith.constant 0 : index
      %75 = vector.load %arg8[%c0_49, %c0_50] : memref<16x1xi32, #tpu.memory_space<vmem>>, vector<16x1xi32>
      tpu.vector_store %arg8[%c0_49, %c0_50], %74 {strides = array<i32>} : memref<16x1xi32, #tpu.memory_space<vmem>>, vector<16x1xi32>,
      %c0_51 = arith.constant 0 : index
      %c0_52 = arith.constant 0 : index
      %76 = vector.load %arg13[%c0_51, %c0_52] : memref<16x1xi32, #tpu.memory_space<vmem>>, vector<16x1xi32>
      %c0_53 = arith.constant 0 : index
      %c0_54 = arith.constant 0 : index
      %77 = vector.load %arg9[%c0_53, %c0_54] : memref<16x1xi32, #tpu.memory_space<vmem>>, vector<16x1xi32>
      tpu.vector_store %arg9[%c0_53, %c0_54], %76 {strides = array<i32>} : memref<16x1xi32, #tpu.memory_space<vmem>>, vector<16x1xi32>,
    } else {
    }
    return
  }
  func.func @transform_0(%arg0: i32, %arg1: i32) -> (i32, i32) {
    %c0_i32 = arith.constant 0 : i32
    %c0_i32_0 = arith.constant 0 : i32
    return %arg0, %c0_i32 : i32, i32
  }
  func.func @transform_1(%arg0: i32, %arg1: i32) -> (i32, i32) {
    %c0_i32 = arith.constant 0 : i32
    %c0_i32_0 = arith.constant 0 : i32
    return %arg1, %c0_i32 : i32, i32
  }
  func.func @transform_2(%arg0: i32, %arg1: i32) -> (i32, i32) {
    %c0_i32 = arith.constant 0 : i32
    %c0_i32_0 = arith.constant 0 : i32
    return %arg0, %c0_i32 : i32, i32
  }
  func.func @transform_3(%arg0: i32, %arg1: i32) -> (i32, i32) {
    %c0_i32 = arith.constant 0 : i32
    %c0_i32_0 = arith.constant 0 : i32
    return %c0_i32, %arg1 : i32, i32
  }
  func.func @transform_4(%arg0: i32, %arg1: i32) -> (i32, i32) {
    %c0_i32 = arith.constant 0 : i32
    %c0_i32_0 = arith.constant 0 : i32
    return %arg0, %c0_i32 : i32, i32
  }
  func.func @transform_5(%arg0: i32, %arg1: i32) -> (i32, i32) {
    %c0_i32 = arith.constant 0 : i32
    %c0_i32_0 = arith.constant 0 : i32
    return %c0_i32, %arg1 : i32, i32
  }
  func.func @transform_6(%arg0: i32, %arg1: i32) -> (i32, i32) {
    %c0_i32 = arith.constant 0 : i32
    %c0_i32_0 = arith.constant 0 : i32
    return %arg0, %c0_i32 : i32, i32
  }
  func.func @transform_7(%arg0: i32, %arg1: i32) -> (i32, i32) {
    %c0_i32 = arith.constant 0 : i32
    %c0_i32_0 = arith.constant 0 : i32
    return %arg0, %c0_i32 : i32, i32
  }
}

module attributes {stable_mosaic.version = 11 : i64} {
  func.func @triplet_loss_kernel(%arg0: i32, %arg1: memref<16xi32, #tpu.memory_space<smem>>, %arg2: memref<16xi32, #tpu.memory_space<smem>>, %arg3: memref<1x1x32xf32, #tpu.memory_space<vmem>>, %arg4: memref<1x1x32xf32, #tpu.memory_space<vmem>>, %arg5: memref<1x1x32xf32, #tpu.memory_space<vmem>>, %arg6: memref<1x1xf32, #tpu.memory_space<vmem>>, %arg7: memref<1x1xf32, #tpu.memory_space<vmem>>) attributes {dimension_semantics = [#tpu.dimension_semantics<arbitrary>], iteration_bounds = array<i64: 16>, scalar_prefetch = 2 : i64, scratch_operands = 1 : i64, tpu.core_type = #tpu.core_type<tc>, window_params = [{transform_indices = @transform_0, window_bounds = array<i64: 1, 1, 32>}, {transform_indices = @transform_1, window_bounds = array<i64: 1, 1, 32>}, {transform_indices = @transform_2, window_bounds = array<i64: 1, 1, 32>}, {pipeline_mode = #tpu.pipeline_mode<synchronous>, transform_indices = @transform_3, window_bounds = array<i64: 1, 1>}]} {
    %c0_i32 = arith.constant 0 : i32
    %0 = arith.cmpi eq, %arg0, %c0_i32 : i32
    %1 = arith.extui %0 : i1 to i32
    %c0_i32_0 = arith.constant 0 : i32
    %2 = arith.cmpi ne, %1, %c0_i32_0 : i32
    scf.if %2 {
      %cst_19 = arith.constant 0.000000e+00 : f32
      %34 = vector.broadcast %cst_19 : f32 to vector<1x1xf32>
      %c0_20 = arith.constant 0 : index
      %c0_21 = arith.constant 0 : index
      %35 = vector.load %arg7[%c0_20, %c0_21] : memref<1x1xf32, #tpu.memory_space<vmem>>, vector<1x1xf32>
      tpu.vector_store %arg7[%c0_20, %c0_21], %34 {strides = array<i32>} : memref<1x1xf32, #tpu.memory_space<vmem>>, vector<1x1xf32>,
    } else {
    }
    %c0 = arith.constant 0 : index
    %c0_1 = arith.constant 0 : index
    %c0_2 = arith.constant 0 : index
    %3 = vector.load %arg3[%c0, %c0_1, %c0_2] : memref<1x1x32xf32, #tpu.memory_space<vmem>>, vector<1x1x32xf32>
    %4 = vector.shape_cast %3 : vector<1x1x32xf32> to vector<1x32xf32>
    %c0_3 = arith.constant 0 : index
    %c0_4 = arith.constant 0 : index
    %c0_5 = arith.constant 0 : index
    %5 = vector.load %arg4[%c0_3, %c0_4, %c0_5] : memref<1x1x32xf32, #tpu.memory_space<vmem>>, vector<1x1x32xf32>
    %6 = vector.shape_cast %5 : vector<1x1x32xf32> to vector<1x32xf32>
    %c0_6 = arith.constant 0 : index
    %c0_7 = arith.constant 0 : index
    %c0_8 = arith.constant 0 : index
    %7 = vector.load %arg5[%c0_6, %c0_7, %c0_8] : memref<1x1x32xf32, #tpu.memory_space<vmem>>, vector<1x1x32xf32>
    %8 = vector.shape_cast %7 : vector<1x1x32xf32> to vector<1x32xf32>
    %9 = arith.subf %4, %6 : vector<1x32xf32>
    %cst = arith.constant 9.99999997E-7 : f32
    %10 = vector.broadcast %cst : f32 to vector<1x32xf32>
    %11 = arith.addf %9, %10 : vector<1x32xf32>
    %12 = arith.mulf %11, %11 : vector<1x32xf32>
    %cst_9 = arith.constant dense<0.000000e+00> : vector<1xf32>
    %13 = vector.multi_reduction <add>, %12, %cst_9 [1] : vector<1x32xf32> to vector<1xf32>
    %14 = vector.shape_cast %13 : vector<1xf32> to vector<1x1xf32>
    %15 = math.sqrt %14 : vector<1x1xf32>
    %16 = arith.subf %4, %8 : vector<1x32xf32>
    %cst_10 = arith.constant 9.99999997E-7 : f32
    %17 = vector.broadcast %cst_10 : f32 to vector<1x32xf32>
    %18 = arith.addf %16, %17 : vector<1x32xf32>
    %19 = arith.mulf %18, %18 : vector<1x32xf32>
    %cst_11 = arith.constant dense<0.000000e+00> : vector<1xf32>
    %20 = vector.multi_reduction <add>, %19, %cst_11 [1] : vector<1x32xf32> to vector<1xf32>
    %21 = vector.shape_cast %20 : vector<1xf32> to vector<1x1xf32>
    %22 = math.sqrt %21 : vector<1x1xf32>
    %c0_12 = arith.constant 0 : index
    %c0_13 = arith.constant 0 : index
    %23 = vector.load %arg7[%c0_12, %c0_13] : memref<1x1xf32, #tpu.memory_space<vmem>>, vector<1x1xf32>
    %24 = arith.subf %15, %22 : vector<1x1xf32>
    %cst_14 = arith.constant 2.000000e-01 : f32
    %25 = vector.broadcast %cst_14 : f32 to vector<1x1xf32>
    %26 = arith.addf %24, %25 : vector<1x1xf32>
    %cst_15 = arith.constant 0.000000e+00 : f32
    %27 = vector.broadcast %cst_15 : f32 to vector<1x1xf32>
    %28 = arith.maximumf %26, %27 : vector<1x1xf32>
    %29 = arith.addf %23, %28 : vector<1x1xf32>
    %c0_16 = arith.constant 0 : index
    %c0_17 = arith.constant 0 : index
    %30 = vector.load %arg7[%c0_16, %c0_17] : memref<1x1xf32, #tpu.memory_space<vmem>>, vector<1x1xf32>
    tpu.vector_store %arg7[%c0_16, %c0_17], %29 {strides = array<i32>} : memref<1x1xf32, #tpu.memory_space<vmem>>, vector<1x1xf32>,
    %c15_i32 = arith.constant 15 : i32
    %31 = arith.cmpi eq, %arg0, %c15_i32 : i32
    %32 = arith.extui %31 : i1 to i32
    %c0_i32_18 = arith.constant 0 : i32
    %33 = arith.cmpi ne, %32, %c0_i32_18 : i32
    scf.if %33 {
      %c0_19 = arith.constant 0 : index
      %c0_20 = arith.constant 0 : index
      %34 = vector.load %arg7[%c0_19, %c0_20] : memref<1x1xf32, #tpu.memory_space<vmem>>, vector<1x1xf32>
      %cst_21 = arith.constant 6.250000e-02 : f32
      %35 = vector.broadcast %cst_21 : f32 to vector<1x1xf32>
      %36 = arith.mulf %34, %35 : vector<1x1xf32>
      %c0_22 = arith.constant 0 : index
      %c0_23 = arith.constant 0 : index
      %37 = vector.load %arg6[%c0_22, %c0_23] : memref<1x1xf32, #tpu.memory_space<vmem>>, vector<1x1xf32>
      tpu.vector_store %arg6[%c0_22, %c0_23], %36 {strides = array<i32>} : memref<1x1xf32, #tpu.memory_space<vmem>>, vector<1x1xf32>,
    } else {
    }
    return
  }
  func.func @transform_0(%arg0: i32, %arg1: memref<16xi32, #tpu.memory_space<smem>>, %arg2: memref<16xi32, #tpu.memory_space<smem>>) -> (i32, i32, i32) {
    %c0_i32 = arith.constant 0 : i32
    %c0_i32_0 = arith.constant 0 : i32
    %c0_i32_1 = arith.constant 0 : i32
    return %arg0, %c0_i32, %c0_i32_0 : i32, i32, i32
  }
  func.func @transform_1(%arg0: i32, %arg1: memref<16xi32, #tpu.memory_space<smem>>, %arg2: memref<16xi32, #tpu.memory_space<smem>>) -> (i32, i32, i32) {
    %0 = arith.index_cast %arg0 : i32 to index
    %1 = memref.load %arg1[%0] : memref<16xi32, #tpu.memory_space<smem>>
    %c0_i32 = arith.constant 0 : i32
    %c0_i32_0 = arith.constant 0 : i32
    %c0_i32_1 = arith.constant 0 : i32
    return %1, %c0_i32, %c0_i32_0 : i32, i32, i32
  }
  func.func @transform_2(%arg0: i32, %arg1: memref<16xi32, #tpu.memory_space<smem>>, %arg2: memref<16xi32, #tpu.memory_space<smem>>) -> (i32, i32, i32) {
    %0 = arith.index_cast %arg0 : i32 to index
    %1 = memref.load %arg2[%0] : memref<16xi32, #tpu.memory_space<smem>>
    %c0_i32 = arith.constant 0 : i32
    %c0_i32_0 = arith.constant 0 : i32
    %c0_i32_1 = arith.constant 0 : i32
    return %1, %c0_i32, %c0_i32_0 : i32, i32, i32
  }
  func.func @transform_3(%arg0: i32, %arg1: memref<16xi32, #tpu.memory_space<smem>>, %arg2: memref<16xi32, #tpu.memory_space<smem>>) -> (i32, i32) {
    %c0_i32 = arith.constant 0 : i32
    %c0_i32_0 = arith.constant 0 : i32
    %c0_i32_1 = arith.constant 0 : i32
    return %c0_i32, %c0_i32_0 : i32, i32
  }
}

</mosaic_0001>

<bundles_post_ra>
// kernel: triplet_forward.2
= control target key start
LH: loop header
LB: loop body
LE: loop exit
PB: predicated region body
PF: predicated region fallthrough
CT: control target
= control target key end

     0   :  { %vm42_vm0 = vcmask 261120   ;;  %v354_v3 = vmov 0   ;;  %vm29_vm1 = vcmask 7168   ;;  %v355_v9 = vmov -inf   ;;  %s538_s1 = inlined_call_operand.vmem [shape: f32[16,32], index: 1, kind: input, shape index: {}, may-alias: {0,1}]   ;;  %s539_s0 = inlined_call_operand.vmem [shape: f32[16,32], index: 0, kind: input, shape index: {}, may-alias: {0,1}]   ;;  %s540_s2 = inlined_call_operand.vmem [shape: f32[16,1], index: 2, kind: input, shape index: {}]   ;;  %s541_s4 = inlined_call_operand.vmem [shape: s32[16,1], index: 4, kind: input, shape index: {}]   ;;  %s542_s3 = inlined_call_operand.vmem [shape: f32[1,16], index: 3, kind: input, shape index: {}]   ;;  %s543_s5 = inlined_call_operand.vmem [shape: s32[1,16], index: 5, kind: input, shape index: {}]   ;;  %s544_s6 = inlined_call_operand.vmem [shape: s32[16,1], index: 6, kind: output, shape index: {0}]   ;;  %s545_s7 = inlined_call_operand.vmem [shape: s32[16,1], index: 7, kind: output, shape index: {1}]  }
   0x1   :  { %v40_v0 = vld [vmem:[%s538_s1] sm:$0xff]  ;;  %v41_v1 = vld [vmem:[%s538_s1 + $0x8] sm:$0xff]  ;;  %352 = vset.pattern.permute.xlu0 %v354_v3  ;;  %353 = vset.pattern.permute.xlu1 %v354_v3  ;;  %31 = vst.msk [vmem:[#allocation2 + $0x8] sm:$0xff] %vm29_vm1, %v355_v9  ;;  %30 = vst.msk [vmem:[#allocation2] sm:$0xff] %vm29_vm1, %v355_v9  ;;  %v158_v10 = vlaneseq  ;;  %vm356_vm4 = vmmov 1   ;;  %vm198_vm10 = vcmask 130048  }
   0x2   :  { %v38_v2 = vld [vmem:[%s539_s0] sm:$0xff]  ;;  %341 = vmatprep.subr.msk.mxu0 %vm42_vm0, %v41_v1  ;;  %v131_v6 = vld [vmem:[%s540_s2 + $0x8] sm:$0xff]  ;;  %34 = vst.msk [vmem:[#allocation4] sm:$0xff] %vm29_vm1, %v354_v3  ;;  %35 = vst.msk [vmem:[#allocation4 + $0x8] sm:$0xff] %vm29_vm1, %v354_v3  ;;  %v357_v39 = vmov inf  }
   0x3   :  { %345 = vmatprep.mubr.msk.f32.mxu0 %vm42_vm0, %v38_v2  ;;  %v130_v4 = vld [vmem:[%s540_s2] sm:$0xff]  ;;  %342 = vmatpush3.xpose.msk.msra.mxu0 %vm42_vm0, %v41_v1  ;;  %v174_v7 = vld [vmem:[%s541_s4 + $0x8] sm:$0xff]  ;;  %36 = vst.msk [vmem:[#allocation5] sm:$0xff] %vm29_vm1, %v354_v3  ;;  %37 = vst.msk [vmem:[#allocation5 + $0x8] sm:$0xff] %vm29_vm1, %v354_v3  ;;  %v159_v12 = vshrl.u32 %v158_v10, 7  ;;  %v434_v14 = vand.u32 127, %v158_v10 }
   0x4   :  { %135 = vperm.xlu0 %352, %v130_v4   ;;  %v173_v5 = vld [vmem:[%s541_s4] sm:$0xff]  ;;  %343 = vmatprep.subr.msk.mxu0 %vm42_vm0, %v40_v0  ;;  %v39_v8 = vld [vmem:[%s539_s0 + $0x8] sm:$0xff]  ;;  %32 = vst.msk [vmem:[#allocation3] sm:$0xff] %vm29_vm1, %v357_v39  ;;  %33 = vst.msk [vmem:[#allocation3 + $0x8] sm:$0xff] %vm29_vm1, %v357_v39 }
   0x5   :  { %177 = vperm.xlu1 %353, %v173_v5   ;;  %v160_v15 = vadd.s32 8, %v159_v12  ;;  %v335_v16 = vld [vmem:[%s542_s3] ss:$0 sm:$0xff]  ;;  %vm169_vm3 = vcmp.eq.s32.totalorder %v159_v12, %v434_v14 }
   0x6   :  { %v336_v19 = vld [vmem:[%s543_s5] ss:$0 sm:$0xff]  ;;  %vm188_vm7 = vmxor %vm169_vm3, %vm356_vm4 }
   0x7   :  { %344 = vmatpush3.xpose.msk.msra.mxu0 %vm42_vm0, %v40_v0  ;;  %vm170_vm2 = vcmp.eq.s32.totalorder %v160_v15, %v434_v14 }
   0x8   :  { %140 = vperm.xlu0 %352, %v131_v6   ;;  %vm189_vm5 = vmxor %vm170_vm2, %vm356_vm4  ;;  %v464_v41 = vld [vmem:[#allocation2 + $0x8] sm:$0xff]  ;;  %v468_v43 = vld [vmem:[#allocation2] sm:$0xff] }
   0x9   :  { %180 = vperm.xlu1 %353, %v174_v7  }
   0xa   :  { %346 = vmatmul.mubr.msk.f32.vlgmr.msra.gmra.mxu0 %vm42_vm0, %v39_v8 }
   0xb   :  { %v483_v49 = vld [vmem:[#allocation3] sm:$0xff]  ;;  %v495_v58 = vld [vmem:[#allocation3 + $0x8] sm:$0xff] }
  0x7f   :  { %v136_v11 = vpop.permute.xlu0 %135 }
  0x80   :  { %v178_v13 = vpop.permute.xlu1 %177  ;;  %v149_v22 = vadd.f32 %v335_v16, %v136_v11 }
  0x81   :  { %vm186_vm8 = vcmp.eq.s32.totalorder %v178_v13, %v336_v19 }
  0x82   :  { %vm190_vm11 = vmand %vm186_vm8, %vm188_vm7 }
  0x83   :  { %v141_v17 = vpop.permute.xlu0 %140  ;;  %vm194_vm12 = vmxor %vm186_vm8, %vm356_vm4 }
  0x84   :  { %v150_v18 = vadd.f32 %v335_v16, %v141_v17  ;;  %v181_v20 = vpop.permute.xlu1 %180 }
  0x85   :  { %vm187_vm6 = vcmp.eq.s32.totalorder %v181_v20, %v336_v19 }
  0x86   :  { %vm191_vm9 = vmand %vm187_vm6, %vm189_vm5 }
  0x87   :  { %vm195_vm13 = vmxor %vm187_vm6, %vm356_vm4 }
  0xca   :  { %v347_v21 = vpop.f32.mrf.mxu0 }
  0xcb   :  { %v152_v23 = vmul.f32 2.0, %v347_v21 }
  0xcc   :  { %v121_v24 = vpop.f32.mrf.mxu0 }
  0xcd   :  { %v154_v25 = vsub.f32 %v150_v18, %v152_v23  ;;  %v151_v26 = vmul.f32 2.0, %v121_v24 }
  0xcf   :  { %v156_v27 = vmax.f32 %v154_v25, 1e-12  ;;  %v153_v28 = vsub.f32 %v149_v22, %v151_v26  ;;  %v288_v26 = vld [vmem:[#allocation4 + $0x8] sm:$0xff] }
  0xd1   :  { %v155_v29 = vmax.f32 %v153_v28, 1e-12  ;;  %v172_v30 = vsel %vm170_vm2, 0.0, %v156_v27 }
  0xd2   :  { %v193_v31 = vsel %vm191_vm9, %v172_v30, -inf  ;;  %v197_v38 = vsel %vm195_vm13, %v172_v30, inf }
  0xd3   :  { %v202_v32 = vsel %vm198_vm10, %v193_v31, -inf  ;;  %v171_v33 = vsel %vm169_vm3, 0.0, %v155_v29  ;;  %v208_v40 = vsel %vm198_vm10, %v197_v38, inf }
  0xd4   :  { %203 = vmax.xlane.f32.xlu1 %v202_v32  ;;  %v192_v34 = vsel %vm190_vm11, %v171_v33, -inf  ;;  %v196_v36 = vsel %vm194_vm12, %v171_v33, inf  ;;  %v287_v32 = vld [vmem:[#allocation4] sm:$0xff] }
  0xd5   :  { %v199_v35 = vsel %vm198_vm10, %v192_v34, -inf  ;;  %v205_v37 = vsel %vm198_vm10, %v196_v36, inf }
  0xd6   :  { %200 = vmax.xlane.f32.xlu0 %v199_v35 }
  0xda   :  { %206 = vmin.xlane.f32.xlu0 %v205_v37 }
  0xde   :  { %209 = vmin.xlane.f32.xlu0 %v208_v40  ;;  %v294_v40 = vld [vmem:[#allocation5] sm:$0xff] }
 0x15d   :  { %v466_v42 = vpop.xlane.xlu1 %203 }
 0x15e   :  { %vm212_vm14 = vcmp.eq.f32.partialorder %v193_v31, %v466_v42  ;;  %v303_v44 = vmax.f32 %v466_v42, %v464_v41  ;;  %vm282_vm9 = vcmp.gt.f32.partialorder %v466_v42, %v464_v41 }
 0x15f   :  { %v473_v45 = vpop.xlane.xlu0 %200  ;;  %v214_v46 = vsel %vm212_vm14, %v434_v14, 2147483647 }
 0x160   :  { %305 = vst.msk [vmem:[#allocation2 + $0x8] sm:$0xff] %vm29_vm1, %v303_v44  ;;  %vm211_vm15 = vcmp.eq.f32.partialorder %v192_v34, %v473_v45  ;;  %vm281_vm0 = vcmp.gt.f32.partialorder %v473_v45, %v468_v43  ;;  %v302_v47 = vmax.f32 %v473_v45, %v468_v43  ;;  %v230_v48 = vsel %vm198_vm10, %v214_v46, 2147483647 }
 0x161   :  { %v232_v50 = vshra.s32 %v230_v48, 16  ;;  %v213_v51 = vsel %vm211_vm15, %v434_v14, 2147483647  ;;  %v231_v5 = vand.u32 65535, %v230_v48  ;;  %v295_v48 = vld [vmem:[#allocation5 + $0x8] sm:$0xff] }
 0x162   :  { %304 = vst.msk [vmem:[#allocation2] sm:$0xff] %vm29_vm1, %v302_v47  ;;  %v215_v52 = vsel %vm198_vm10, %v213_v51, 2147483647 }
 0x163   :  { %v488_v53 = vpop.xlane.xlu0 %206  ;;  %v234_v54 = vcvt.s32.f32 %v232_v50  ;;  %v217_v55 = vshra.s32 %v215_v52, 16  ;;  %v216_v6 = vand.u32 65535, %v215_v52  ;;  %v233_v8 = vcvt.s32.f32 %v231_v5 }
 0x164   :  { %vm245_vm2 = vcmp.eq.f32.partialorder %v196_v36, %v488_v53  ;;  %vm285_vm3 = vcmp.lt.f32.partialorder %v488_v53, %v483_v49  ;;  %v308_v56 = vmin.f32 %v488_v53, %v483_v49 }
 0x165   :  { %235 = vmin.xlane.f32.xlu0 %v234_v54  ;;  %v219_v57 = vcvt.s32.f32 %v217_v55  ;;  %v247_v59 = vsel %vm245_vm2, %v434_v14, 2147483647  ;;  %v218_v11 = vcvt.s32.f32 %v216_v6 }
 0x166   :  { %310 = vst.msk [vmem:[#allocation3] sm:$0xff] %vm29_vm1, %v308_v56  ;;  %v249_v60 = vsel %vm198_vm10, %v247_v59, 2147483647 }
 0x167   :  { %220 = vmin.xlane.f32.xlu1 %v219_v57  ;;  %v500_v61 = vpop.xlane.xlu0 %209  ;;  %v251_v62 = vshra.s32 %v249_v60, 16  ;;  %v250_v12 = vand.u32 65535, %v249_v60 }
 0x168   :  { %vm246_vm4 = vcmp.eq.f32.partialorder %v197_v38, %v500_v61  ;;  %v309_v63 = vmin.f32 %v500_v61, %v495_v58 }
 0x169   :  { %v253_v0 = vcvt.s32.f32 %v251_v62  ;;  %v248_v1 = vsel %vm246_vm4, %v434_v14, 2147483647  ;;  %v252_v15 = vcvt.s32.f32 %v250_v12 }
 0x16a   :  { %311 = vst.msk [vmem:[#allocation3 + $0x8] sm:$0xff] %vm29_vm1, %v309_v63  ;;  %v264_v2 = vsel %vm198_vm10, %v248_v1, 2147483647  ;;  %vm286_vm10 = vcmp.lt.f32.partialorder %v500_v61, %v495_v58 }
 0x16b   :  { %254 = vmin.xlane.f32.xlu1 %v253_v0  ;;  %v266_v3 = vshra.s32 %v264_v2, 16  ;;  %v265_v16 = vand.u32 65535, %v264_v2 }
 0x16d   :  { %v268_v4 = vcvt.s32.f32 %v266_v3  ;;  %v267_v19 = vcvt.s32.f32 %v265_v16 }
 0x16f   :  { %269 = vmin.xlane.f32.xlu0 %v268_v4 }
 0x1ee   :  { %v236_v7 = vpop.xlane.xlu0 %235 }
 0x1ef   :  { %vm237_vm5 = vcmp.eq.f32.partialorder %v234_v54, %v236_v7  ;;  %v242_v21 = vcvt.f32.s32 %v236_v7 }
 0x1f0   :  { %v221_v9 = vpop.xlane.xlu1 %220  ;;  %v238_v10 = vsel %vm237_vm5, %v233_v8, inf }
 0x1f1   :  { %239 = vmin.xlane.f32.xlu0 %v238_v10  ;;  %vm222_vm6 = vcmp.eq.f32.partialorder %v219_v57, %v221_v9  ;;  %v227_v22 = vcvt.f32.s32 %v221_v9  ;;  %v243_v24 = vshll.u32 %v242_v21, 16 }
 0x1f2   :  { %v223_v13 = vsel %vm222_vm6, %v218_v11, inf }
 0x1f3   :  { %224 = vmin.xlane.f32.xlu1 %v223_v13  ;;  %v228_v28 = vshll.u32 %v227_v22, 16 }
 0x1f4   :  { %v255_v14 = vpop.xlane.xlu1 %254 }
 0x1f5   :  { %vm256_vm7 = vcmp.eq.f32.partialorder %v253_v0, %v255_v14  ;;  %v261_v29 = vcvt.f32.s32 %v255_v14 }
 0x1f6   :  { %v257_v17 = vsel %vm256_vm7, %v252_v15, inf }
 0x1f7   :  { %258 = vmin.xlane.f32.xlu1 %v257_v17  ;;  %v262_v36 = vshll.u32 %v261_v29, 16 }
 0x1f8   :  { %v270_v18 = vpop.xlane.xlu0 %269 }
 0x1f9   :  { %vm271_vm8 = vcmp.eq.f32.partialorder %v268_v4, %v270_v18  ;;  %v276_v37 = vcvt.f32.s32 %v270_v18 }
 0x1fa   :  { %v272_v20 = vsel %vm271_vm8, %v267_v19, inf }
 0x1fb   :  { %273 = vmin.xlane.f32.xlu0 %v272_v20  ;;  %v277_v47 = vshll.u32 %v276_v37, 16 }
 0x27a   :  { %v240_v23 = vpop.xlane.xlu0 %239 }
 0x27b   :  { %v241_v25 = vcvt.f32.s32 %v240_v23 }
 0x27c   :  { %v225_v27 = vpop.xlane.xlu1 %224 }
 0x27d   :  { %v244_v30 = vadd.s32 %v243_v24, %v241_v25  ;;  %v226_v31 = vcvt.f32.s32 %v225_v27 }
 0x27f   :  { %v290_v33 = vsel %vm282_vm9, %v244_v30, %v288_v26  ;;  %v229_v34 = vadd.s32 %v228_v28, %v226_v31 }
 0x280   :  { %293 = vst.msk [vmem:[#allocation4 + $0x8] sm:$0xff] %vm29_vm1, %v290_v33  ;;  %v259_v35 = vpop.xlane.xlu1 %258 }
 0x281   :  { %v289_v38 = vsel %vm281_vm0, %v229_v34, %v287_v32  ;;  %v260_v39 = vcvt.f32.s32 %v259_v35 }
 0x282   :  { %292 = vst.msk [vmem:[#allocation4] sm:$0xff] %vm29_vm1, %v289_v38 }
 0x283   :  { %v263_v44 = vadd.s32 %v262_v36, %v260_v39 }
 0x284   :  { %v274_v46 = vpop.xlane.xlu0 %273 }
 0x285   :  { %v296_v41 = vsel %vm285_vm3, %v263_v44, %v294_v40  ;;  %v275_v42 = vcvt.f32.s32 %v274_v46 }
 0x286   :  { %298 = vst.msk [vmem:[#allocation5] sm:$0xff] %vm29_vm1, %v296_v41 }
 0x287   :  { %v316_v50 = vld [vmem:[#allocation4 + $0x8] sm:$0xff]  ;;  %v278_v51 = vadd.s32 %v277_v47, %v275_v42 }
 0x288   :  { %318 = vst.msk [vmem:[%s544_s6 + $0x8] sm:$0xff] %vm29_vm1, %v316_v50 }
 0x289   :  { %v315_v43 = vld [vmem:[#allocation4] sm:$0xff]  ;;  %v297_v45 = vsel %vm286_vm10, %v278_v51, %v295_v48 }
 0x28a   :  { %317 = vst.msk [vmem:[%s544_s6] sm:$0xff] %vm29_vm1, %v315_v43  ;;  %299 = vst.msk [vmem:[#allocation5 + $0x8] sm:$0xff] %vm29_vm1, %v297_v45 }
 0x28d   :  { %v319_v49 = vld [vmem:[#allocation5] sm:$0xff] }
 0x28e   :  { %321 = vst.msk [vmem:[%s545_s7] sm:$0xff] %vm29_vm1, %v319_v49 }
 0x291   :  { %v320_v52 = vld [vmem:[#allocation5 + $0x8] sm:$0xff] }
 0x292   :  { %322 = vst.msk [vmem:[%s545_s7 + $0x8] sm:$0xff] %vm29_vm1, %v320_v52 }

// kernel: triplet_forward.3
= control target key start
LH: loop header
LB: loop body
LE: loop exit
PB: predicated region body
PF: predicated region fallthrough
CT: control target
= control target key end

     0   :  { %s490_s0 = inlined_call_operand.vmem [shape: s32[16], index: 0, kind: input, shape index: {}]   ;;  %s491_s2 = inlined_call_operand.vmem [shape: f32[16,1,32], index: 2, kind: input, shape index: {}, may-alias: {2,3,4}]   ;;  %s492_s3 = inlined_call_operand.vmem [shape: f32[16,1,32], index: 3, kind: input, shape index: {}, may-alias: {2,3,4}]   ;;  %s493_s4 = inlined_call_operand.vmem [shape: f32[16,1,32], index: 4, kind: input, shape index: {}, may-alias: {2,3,4}]   ;;  %s494_s5 = inlined_call_operand.hbm [shape: f32[1,1], index: 5, kind: output, shape index: {}]   ;;  %s495_s1 = inlined_call_operand.vmem [shape: s32[16], index: 1, kind: input, shape index: {}]  }
   0x1   :  { %s10_s20 = sshll.u32 %s490_s0, 4  ;;  %s14_s23 = sshll.u32 %s495_s1, 4  ;;  %s11_s20 = int_to_ptr.vmem [resolvable:$true] %s10_s20  ;;  %s15_s23 = int_to_ptr.vmem [resolvable:$true] %s14_s23 }
   0x2   :  { %s348_s24 = scalar_lea.vmem %s11_s20, 16  ;;  %p353_p1 = scmp.lt.s32.totalorder %s11_s20, %s11_s20 }
   0x3   :  { %p349_p0 = scmp.ne.s32.totalorder %s11_s20, %s348_s24  ;;  %p354_p2 = scmp.lt.s32.totalorder %s348_s24, %s348_s24 }
   0x5   :  { %p355_p3 = por %p354_p2, %p353_p1 }
   0x7   :  { %p356_p4 = pnand %p355_p3, %p349_p0 }
   0x9   :  { %359 = shalt.err (!%p356_p4)  }
   0xa   :  { %s410_s25 = smov [#allocation4]   ;;  %s360_s26 = scalar_lea.vmem %s15_s23, 16 }
   0xb   :  { %13 = dma.vmem_to_smem %s11_s20, 16, %s410_s25, [#allocation3] }
   0xc   :  { %p361_p5 = scmp.ne.s32.totalorder %s15_s23, %s360_s26  ;;  %p365_p6 = scmp.lt.s32.totalorder %s15_s23, %s15_s23 }
   0xd   :  { %p366_p7 = scmp.lt.s32.totalorder %s360_s26, %s360_s26 }
   0xf   :  { %p367_p8 = por %p366_p7, %p365_p6 }
  0x11   :  { %p368_p9 = pnand %p367_p8, %p361_p5 }
  0x13   :  { %371 = shalt.err (!%p368_p9)  }
  0x14   :  { %s411_s0 = smov [#allocation5]  }
  0x15   :  { %17 = dma.vmem_to_smem %s15_s23, 16, %s411_s0, [#allocation3] }
  0x16   :  { %400 = dma.done.wait [#allocation3], 32 }
  0x17   :  { %401 = vsyncadd [#allocation3], 4294967264 }
  0x18   :  { %19 = sfence }
  0x19   :  { %20 = vsyncpa [#allocation7], 0  ;;  %s450_s1 = smov 0  }
  0x1a LB: > { %s456_s27 = sadd.s32 4294967295, %s408_s1   ;;  %p319_p10 = scmp.ge.s32.totalorder %s408_s1, 1  ;;  %s408_s1 = sphi %s450_s1, %s26_s1  }
  0x1b   : > { %p167_p11 = scmp.lt.s32.totalorder %s408_s1, 17 }
  0x1d   : > { %p168_p12 = pnand %p319_p10, %p167_p11 }
  0x1e   : > { %p192_p13 = scmp.lt.s32.totalorder (!%p168_p12), %s456_s27, 15  ;;  %s195_s28 = sld [smem:[#allocation4 + %s456_s27]] (!%p168_p12) }
  0x1f   : > { %171 = sbr.rel (%p168_p12) target bundleno = 248 (0xf8), region = 32  ;;  %s200_s29 = sld [smem:[#allocation5 + %s456_s27]] (!%p168_p12) }
  0x20   : > { %p320_p2 = scmp.ne.s32.totalorder (!%p168_p12), %s456_s27, 0 }
  0x24   : > { %s193_s30 = scalar_select %p192_p13, %s456_s27, 15 }
  0x25   : > { %p196_p0 = scmp.lt.s32.totalorder %s195_s28, 15  ;;  %p201_p1 = scmp.lt.s32.totalorder %s200_s29, 15 }
  0x26   : > { %s194_s8 = scalar_lea.vmem %s491_s2, %s193_s30  ;;  %208 = sbr.rel (%p320_p2) target bundleno = 45 (0x2d), region = 36 }
  0x27   : > { %s497_s28 = smov (!%p196_p0, %s195_s28), 15  ;;  %s499_s29 = smov (!%p201_p1, %s200_s29), 15 }
  0x28   : > { %s198_s11 = scalar_lea.vmem %s492_s3, %s497_s28  ;;  %s203_s14 = scalar_lea.vmem %s493_s4, %s499_s29 }
  0x2b   : > { %vm209_vm0 = vcmask 0   ;;  %v412_v0 = vmov 0.0  }
  0x2c   : > { %210 = vst.msk [vmem:[#allocation2] sm:$0x1] %vm209_vm0, %v412_v0 }
  0x2d PF: > { %v211_v1 = vld [vmem:[%s194_s8] sm:$0x1]  ;;  %vm217_vm1 = vcmask 253952   ;;  %vm246_vm6 = vcmask 0   ;;  %p321_p3 = scmp.ne.s32.totalorder %s456_s27, 15 }
  0x2e   : > { %v212_v2 = vld [vmem:[%s198_s11] sm:$0x1] }
  0x2f   : > { %v214_v3 = vsub.f32 %v211_v1, %v212_v2  ;;  %v213_v4 = vld [vmem:[%s203_s14] sm:$0x1] }
  0x30   : > { %v228_v5 = vsub.f32 %v211_v1, %v213_v4 }
  0x31   : > { %v215_v6 = vadd.f32 1e-06, %v214_v3 }
  0x32   : > { %v229_v7 = vadd.f32 1e-06, %v228_v5 }
  0x33   : > { %v216_v8 = vmul.f32 %v215_v6, %v215_v6  ;;  %v241_v26 = vld [vmem:[#allocation2] sm:$0x1] }
  0x34   : > { %v230_v9 = vmul.f32 %v229_v7, %v229_v7 }
  0x35   : > { %v218_v10 = vsel %vm217_vm1, %v216_v8, 0.0 }
  0x36   : > { %219 = vadd.xlane.f32.xlu0 %v218_v10  ;;  %v231_v11 = vsel %vm217_vm1, %v230_v9, 0.0 }
  0x3a   : > { %232 = vadd.xlane.f32.xlu0 %v231_v11 }
  0xbf   : > { %v220_v12 = vpop.xlane.xlu0 %219 }
  0xc0   : > { %344 = vrsqrt.f32 %v220_v12  ;;  %vm223_vm2 = vcmp.eq.f32.partialorder %v220_v12, inf  ;;  %v226_v19 = vand.u32 2147483648, %v220_v12  ;;  %vm225_vm4 = vcmp.eq.f32.partialorder %v220_v12, 0.0 }
  0xc3   : > { %v233_v13 = vpop.xlane.xlu0 %232 }
  0xc4   : > { %346 = vrsqrt.f32 %v233_v13  ;;  %vm236_vm3 = vcmp.eq.f32.partialorder %v233_v13, inf  ;;  %v239_v20 = vand.u32 2147483648, %v233_v13  ;;  %vm238_vm5 = vcmp.eq.f32.partialorder %v233_v13, 0.0 }
  0xcd   : > { %v345_v14 = vpop.eup %344 }
  0xce   : > { %v222_v15 = vmul.f32 %v345_v14, %v220_v12 }
  0xd0   : > { %v224_v17 = vsel %vm223_vm2, %v220_v12, %v222_v15 }
  0xd1   : > { %v347_v16 = vpop.eup %346  ;;  %v227_v22 = vsel %vm225_vm4, %v226_v19, %v224_v17 }
  0xd2   : > { %v235_v18 = vmul.f32 %v347_v16, %v233_v13 }
  0xd4   : > { %v237_v21 = vsel %vm236_vm3, %v233_v13, %v235_v18 }
  0xd5   : > { %v240_v23 = vsel %vm238_vm5, %v239_v20, %v237_v21 }
  0xd6   : > { %v242_v24 = vsub.f32 %v227_v22, %v240_v23 }
  0xd8   : > { %v243_v25 = vadd.f32 0.2, %v242_v24 }
  0xda   : > { %v244_v27 = vmax.f32 %v243_v25, 0.0  ;;  %251 = sbr.rel (%p321_p3) target bundleno = 233 (0xe9), region = 40 }
  0xdc   : > { %v245_v28 = vadd.f32 %v244_v27, %v241_v26 }
  0xde   : > { %247 = vst.msk [vmem:[#allocation2] sm:$0x1] %vm246_vm6, %v245_v28 }
  0xe5   : > { %v252_v29 = vld [vmem:[#allocation2] sm:$0x1] }
  0xe6   : > { %v253_v30 = vmul.f32 0.0625, %v252_v29 }
  0xe8   : > { %254 = vst.msk [vmem:[#allocation6] sm:$0x1] %vm246_vm6, %v253_v30 }
  0xe9 PF: > { %p330_p4 = scmp.eq.s32.totalorder %s456_s27, 15  ;;  %s413_s15 = smov [#allocation6]  }
  0xea   : > { %s262_s16 = sshll.u32 %s413_s15, 4  ;;  %s263_s16 = int_to_ptr.vmem [resolvable:$true] %s262_s16 }
  0xeb   : > { %s372_s17 = scalar_lea.vmem %s263_s16, 16  ;;  %s378_s18 = scalar_lea.vmem %s263_s16, 32 }
  0xec   : > { %p373_p5 = scmp.ne.s32.totalorder %s263_s16, %s372_s17  ;;  %p379_p8 = scmp.lt.s32.totalorder %s263_s16, %s263_s16 }
  0xed   : > { %p380_p9 = scmp.lt.s32.totalorder %s378_s18, %s372_s17 }
  0xee   : > { %p374_p6 = pnand %p373_p5, %p330_p4 }
  0xef   : > { %p381_p10 = por %p380_p9, %p379_p8 }
  0xf0   : > { %p375_p7 = pneg %p374_p6 }
  0xf2   : > { %p382_p11 = pnand %p381_p10, %p375_p7 }
  0xf4   : > { %385 = shalt.err (!%p382_p11)
}
  0xf5   : > { %327 = dma.vmem_to_hbm [thread:$0]  (%p330_p4), %s263_s16, 16, %s494_s5, [#allocation7]  }
  0xf6   : > { %403 = dma.done.wait (%p330_p4), [#allocation7], 16  }
  0xf7   : > { %405 = vsyncadd (%p330_p4), [#allocation7], 4294967280 }
  0xf8 PF: > { %s26_s1 = sadd.s32 1, %s408_s1  }
  0xf9   : > { %p23_p12 = scmp.ge.s32.totalorder %s26_s1, 18  }
  0xfb   :  { %25 = sbr.rel (!%p23_p12) target bundleno = 26 (0x1a), region = 73 }
 0x100   :  { %275 = vsyncpa [#allocation7], 1 }
 0x101   :  { %277 = vsyncpa [#allocation7 + $0x1], 1 }

</bundles_post_ra>
